<compile_context>
chip_gen: v6e
topology: v6e:2x2x1
jax: 0.10.0
libtpu: 0.0.40
codegen_flags: <defaults>
</compile_context>

<pallas_src>
import math
import jax
import jax.numpy as jnp
from jax.experimental import pallas as pl
from jax.experimental.pallas import tpu as pltpu


def dqn_kernel(x_ref, w1_ref, b1_ref, w2_ref, b2_ref, w3_ref, b3_ref, o_ref):
    # x_ref: (5, TB) bf16 — features on sublanes, batch columns on lanes.
    x = x_ref[...]

    # Layer 1 (MXU): (64, 5) @ (5, TB) -> (64, TB), f32 accumulation, bias + ReLU.
    h1 = jnp.dot(w1_ref[...], x, preferred_element_type=jnp.float32)
    h1 = jnp.maximum(h1 + b1_ref[...], 0.0)          # b1: (64, 1) broadcasts over lanes

    # Layer 2 (MXU): (64, 64) @ (64, TB) -> (64, TB).
    # NOTE: W2 is grid-invariant; if bundle dumps show it re-pushed to the MXU every
    # step, drive the MXU explicitly (pltpu.matmul_push_rhs / acc_lhs / pop).
    h2 = jnp.dot(w2_ref[...], h1.astype(jnp.bfloat16),
                 preferred_element_type=jnp.float32)
    h2 = jnp.maximum(h2 + b2_ref[...], 0.0)

    # Layer 3 (VPU + XLU, off the MXU):  out[b] = sum_k w3[k] * h2[k, b]  -> (1, TB).
    out = jnp.sum(h2 * w3_ref[...], axis=0, keepdims=True) + b3_ref[0]
    o_ref[...] = out.astype(o_ref.dtype)


def _auto_tile(batch, cap=8192):
    """Batch tile: multiple of 128 lanes, >= 2 balanced tiles (feeds both v7x
    TensorCores), capped so the (64, tb) f32 intermediates stay well inside VMEM."""
    tb = ((pl.cdiv(batch, 2) + 127) // 128) * 128
    return int(max(128, min(cap, tb)))


def _dqn_pallas(x_fm, w1, b1, w2, b2, w3, b3, tb):
    """Core call. x_fm: (5, B_pad) feature-major, B_pad % tb == 0. Returns (1, B_pad) f32."""
    F, b_pad = x_fm.shape
    n_tiles = b_pad // tb

    w1b = w1.astype(jnp.bfloat16)                   # (64, 5)  MXU operand, layer 1
    w2b = w2.astype(jnp.bfloat16)                   # (64, 64) MXU operand, layer 2
    b1c = b1.reshape(-1, 1).astype(jnp.float32)     # (64, 1)
    b2c = b2.reshape(-1, 1).astype(jnp.float32)     # (64, 1)
    w3c = w3.reshape(-1, 1).astype(jnp.float32)     # (64, 1) f32 column -> VPU path
    b3s = b3.reshape(-1).astype(jnp.float32)        # (1,) scalar -> SMEM

    const = lambda shape: pl.BlockSpec(shape, lambda i: (0, 0))  # VMEM-resident weights

    return pl.pallas_call(
        dqn_kernel,
        out_shape=jax.ShapeDtypeStruct((1, b_pad), jnp.float32),
        grid=(n_tiles,),
        in_specs=[
            pl.BlockSpec((F, tb), lambda i: (0, i)),              # x tile: batch stream
            const(w1b.shape), const(b1c.shape),
            const(w2b.shape), const(b2c.shape),
            const(w3c.shape),
            pl.BlockSpec(memory_space=pltpu.MemorySpace.SMEM),    # b3 scalar in SMEM
        ],
        out_specs=pl.BlockSpec((1, tb), lambda i: (0, i)),        # lane-dense output slab
        compiler_params=pltpu.CompilerParams(
            dimension_semantics=("parallel",),                    # v7x megacore split
            vmem_limit_bytes=32 * 1024 * 1024,                    # raise v5e's 16 MiB default
        ),
    )(x_fm.astype(jnp.bfloat16), w1b, b1c, w2b, b2c, w3c, b3s)


def deep_q_network_feature_major(x_fm, w1, b1, w2, b2, w3, b3, *, tb=None):
    """Fast path: producer supplies feature-major x_fm of shape (5, B) (bf16
    recommended) — no wrapper-side transpose pass over x. Returns (B, 1) float32."""
    F, B = x_fm.shape
    assert F == 5
    if tb is None:
        tb = _auto_tile(B)
    n_tiles = pl.cdiv(B, tb)
    b_pad = n_tiles * tb
    if b_pad != B:
        x_fm = jnp.pad(x_fm, ((0, 0), (0, b_pad - B)))
    out = _dqn_pallas(x_fm, w1, b1, w2, b2, w3, b3, tb)
    return out[0, :B].reshape(B, 1)


def deep_q_network(x, w1, b1, w2, b2, w3, b3, *, tb=None):
    """PyTorch-equivalent forward.

    x:  (B, 5) float32
    wK: PyTorch layout (out_features, in_features); bK: (out_features,)
    Returns (B, 1) float32.
    """
    B, F = x.shape
    assert F == 5
    if tb is None:
        tb = _auto_tile(B)
    n_tiles = pl.cdiv(B, tb)
    b_pad = n_tiles * tb

    # Single fused pad+transpose+cast pass; producers that can emit feature-major
    # bf16 should call deep_q_network_feature_major and skip it.
    x_fm = jnp.zeros((F, b_pad), dtype=jnp.bfloat16).at[:, :B].set(
        x.T.astype(jnp.bfloat16))

    # NOTE: padded batch columns carry ReLU(bias) garbage through the layers; they
    # are sliced off below and must never be consumed directly.
    out = _dqn_pallas(x_fm, w1, b1, w2, b2, w3, b3, tb)
    return out[0, :B].reshape(B, 1)


def xavier_uniform(key, fan_out, fan_in):
    # Matches torch.nn.init.xavier_uniform_ on an (out, in) weight.
    bound = math.sqrt(6.0 / (fan_in + fan_out))
    return jax.random.uniform(
        key, (fan_out, fan_in), dtype=jnp.float32, minval=-bound, maxval=bound
    )


def _ref_f32(x, w1, b1, w2, b2, w3, b3):
    h1 = jnp.maximum(x @ w1.T + b1, 0.0)
    h2 = jnp.maximum(h1 @ w2.T + b2, 0.0)
    return h2 @ w3.T + b3


def _ref_kernel_recipe(x, w1, b1, w2, b2, w3, b3):
    # Same numerics as the kernel: bf16 operands / f32 acc for layers 1-2,
    # f32 (VPU-path) multiply-reduce for layer 3.
    bf = jnp.bfloat16
    h1 = jnp.maximum(
        jnp.dot(x.astype(bf), w1.T.astype(bf), preferred_element_type=jnp.float32) + b1, 0.0)
    h2 = jnp.maximum(
        jnp.dot(h1.astype(bf), w2.T.astype(bf), preferred_element_type=jnp.float32) + b2, 0.0)
    return h2 @ w3.T + b3


if __name__ == "__main__":
    key = jax.random.PRNGKey(0)
    k_x, k1, k2, k3 = jax.random.split(key, 4)

    B = 200  # small batch; input features = 5 as in nn.Linear(5, 64)
    x = jax.random.normal(k_x, (B, 5), dtype=jnp.float32)

    # Deterministic parameter init (xavier_uniform weights, zero biases),
    # stored in PyTorch (out_features, in_features) layout.
    w1 = xavier_uniform(k1, 64, 5)
    b1 = jnp.zeros((64,), dtype=jnp.float32)
    w2 = xavier_uniform(k2, 64, 64)
    b2 = jnp.zeros((64,), dtype=jnp.float32)
    w3 = xavier_uniform(k3, 1, 64)
    b3 = jnp.zeros((1,), dtype=jnp.float32)

    # Batch-major (PyTorch-shaped) entry point; auto tile -> 2 x 128-lane tiles here.
    out = deep_q_network(x, w1, b1, w2, b2, w3, b3)
    out = jax.block_until_ready(out)
    assert out.shape == (B, 1)

    # Producer-side feature-major path (skips the wrapper transpose pass over x).
    out_fm = deep_q_network_feature_major(
        jnp.asarray(x.T, dtype=jnp.bfloat16), w1, b1, w2, b2, w3, b3)
    out_fm = jax.block_until_ready(out_fm)

    ref_recipe = _ref_kernel_recipe(x, w1, b1, w2, b2, w3, b3)
    ref_f32 = _ref_f32(x, w1, b1, w2, b2, w3, b3)
    assert jnp.allclose(out, out_fm, atol=1e-5, rtol=1e-5)
    assert jnp.allclose(out, ref_recipe, atol=1e-4, rtol=1e-4)
    assert jnp.allclose(out, ref_f32, atol=5e-2, rtol=5e-2)

    print("KERNEL_OK")
</pallas_src>

<mosaic_0001>
module attributes {stable_mosaic.version = 11 : i64} {
  func.func @dqn_kernel(%arg0: i32, %arg1: memref<5x128xbf16, #tpu.memory_space<vmem>>, %arg2: memref<64x5xbf16, #tpu.memory_space<vmem>>, %arg3: memref<64x1xf32, #tpu.memory_space<vmem>>, %arg4: memref<64x64xbf16, #tpu.memory_space<vmem>>, %arg5: memref<64x1xf32, #tpu.memory_space<vmem>>, %arg6: memref<64x1xf32, #tpu.memory_space<vmem>>, %arg7: memref<1xf32, #tpu.memory_space<smem>>, %arg8: memref<1x128xf32, #tpu.memory_space<vmem>>) attributes {dimension_semantics = [#tpu.dimension_semantics<parallel>], iteration_bounds = array<i64: 2>, scalar_prefetch = 0 : i64, scratch_operands = 0 : i64, tpu.core_type = #tpu.core_type<tc>, window_params = [{transform_indices = @transform_0, window_bounds = array<i64: 5, 128>}, {pipeline_mode = #tpu.pipeline_mode<synchronous>, transform_indices = @transform_1, window_bounds = array<i64: 64, 5>}, {pipeline_mode = #tpu.pipeline_mode<synchronous>, transform_indices = @transform_2, window_bounds = array<i64: 64, 1>}, {pipeline_mode = #tpu.pipeline_mode<synchronous>, transform_indices = @transform_3, window_bounds = array<i64: 64, 64>}, {pipeline_mode = #tpu.pipeline_mode<synchronous>, transform_indices = @transform_4, window_bounds = array<i64: 64, 1>}, {pipeline_mode = #tpu.pipeline_mode<synchronous>, transform_indices = @transform_5, window_bounds = array<i64: 64, 1>}, {transform_indices = @transform_6, window_bounds = array<i64: 1>}, {transform_indices = @transform_7, window_bounds = array<i64: 1, 128>}]} {
    %c0 = arith.constant 0 : index
    %c0_0 = arith.constant 0 : index
    %0 = vector.load %arg1[%c0, %c0_0] : memref<5x128xbf16, #tpu.memory_space<vmem>>, vector<5x128xbf16>
    %c0_1 = arith.constant 0 : index
    %c0_2 = arith.constant 0 : index
    %1 = vector.load %arg2[%c0_1, %c0_2] : memref<64x5xbf16, #tpu.memory_space<vmem>>, vector<64x5xbf16>
    %cst = arith.constant dense<0.000000e+00> : vector<64x128xf32>
    %2 = tpu.matmul %1, %0, %cst {dimension_numbers = #tpu.dot_dimension_numbers<[1], [0], [0], [1], [0, 0, 1, 1], [], []>} : vector<64x5xbf16>, vector<5x128xbf16>, vector<64x128xf32> -> vector<64x128xf32>
    %c0_3 = arith.constant 0 : index
    %c0_4 = arith.constant 0 : index
    %3 = vector.load %arg3[%c0_3, %c0_4] : memref<64x1xf32, #tpu.memory_space<vmem>>, vector<64x1xf32>
    %4 = vector.broadcast %3 : vector<64x1xf32> to vector<64x128xf32>
    %5 = arith.addf %2, %4 : vector<64x128xf32>
    %cst_5 = arith.constant 0.000000e+00 : f32
    %6 = vector.broadcast %cst_5 : f32 to vector<64x128xf32>
    %7 = arith.maximumf %5, %6 : vector<64x128xf32>
    %c0_6 = arith.constant 0 : index
    %c0_7 = arith.constant 0 : index
    %8 = vector.load %arg4[%c0_6, %c0_7] : memref<64x64xbf16, #tpu.memory_space<vmem>>, vector<64x64xbf16>
    %9 = arith.truncf %7 : vector<64x128xf32> to vector<64x128xbf16>
    %cst_8 = arith.constant dense<0.000000e+00> : vector<64x128xf32>
    %10 = tpu.matmul %8, %9, %cst_8 {dimension_numbers = #tpu.dot_dimension_numbers<[1], [0], [0], [1], [0, 0, 1, 1], [], []>} : vector<64x64xbf16>, vector<64x128xbf16>, vector<64x128xf32> -> vector<64x128xf32>
    %c0_9 = arith.constant 0 : index
    %c0_10 = arith.constant 0 : index
    %11 = vector.load %arg5[%c0_9, %c0_10] : memref<64x1xf32, #tpu.memory_space<vmem>>, vector<64x1xf32>
    %12 = vector.broadcast %11 : vector<64x1xf32> to vector<64x128xf32>
    %13 = arith.addf %10, %12 : vector<64x128xf32>
    %cst_11 = arith.constant 0.000000e+00 : f32
    %14 = vector.broadcast %cst_11 : f32 to vector<64x128xf32>
    %15 = arith.maximumf %13, %14 : vector<64x128xf32>
    %c0_12 = arith.constant 0 : index
    %c0_13 = arith.constant 0 : index
    %16 = vector.load %arg6[%c0_12, %c0_13] : memref<64x1xf32, #tpu.memory_space<vmem>>, vector<64x1xf32>
    %17 = vector.broadcast %16 : vector<64x1xf32> to vector<64x128xf32>
    %18 = arith.mulf %15, %17 : vector<64x128xf32>
    %cst_14 = arith.constant dense<0.000000e+00> : vector<128xf32>
    %19 = vector.multi_reduction <add>, %18, %cst_14 [0] : vector<64x128xf32> to vector<128xf32>
    %20 = vector.shape_cast %19 : vector<128xf32> to vector<1x128xf32>
    %c0_15 = arith.constant 0 : index
    %21 = memref.load %arg7[%c0_15] : memref<1xf32, #tpu.memory_space<smem>>
    %22 = vector.broadcast %21 : f32 to vector<1x128xf32>
    %23 = arith.addf %20, %22 : vector<1x128xf32>
    %c0_16 = arith.constant 0 : index
    %c0_17 = arith.constant 0 : index
    %24 = vector.load %arg8[%c0_16, %c0_17] : memref<1x128xf32, #tpu.memory_space<vmem>>, vector<1x128xf32>
    tpu.vector_store %arg8[%c0_16, %c0_17], %23 {strides = array<i32>} : memref<1x128xf32, #tpu.memory_space<vmem>>, vector<1x128xf32>,
    return
  }
  func.func @transform_0(%arg0: i32) -> (i32, i32) {
    %c0_i32 = arith.constant 0 : i32
    %c0_i32_0 = arith.constant 0 : i32
    return %c0_i32, %arg0 : i32, i32
  }
  func.func @transform_1(%arg0: i32) -> (i32, i32) {
    %c0_i32 = arith.constant 0 : i32
    %c0_i32_0 = arith.constant 0 : i32
    %c0_i32_1 = arith.constant 0 : i32
    return %c0_i32, %c0_i32_0 : i32, i32
  }
  func.func @transform_2(%arg0: i32) -> (i32, i32) {
    %c0_i32 = arith.constant 0 : i32
    %c0_i32_0 = arith.constant 0 : i32
    %c0_i32_1 = arith.constant 0 : i32
    return %c0_i32, %c0_i32_0 : i32, i32
  }
  func.func @transform_3(%arg0: i32) -> (i32, i32) {
    %c0_i32 = arith.constant 0 : i32
    %c0_i32_0 = arith.constant 0 : i32
    %c0_i32_1 = arith.constant 0 : i32
    return %c0_i32, %c0_i32_0 : i32, i32
  }
  func.func @transform_4(%arg0: i32) -> (i32, i32) {
    %c0_i32 = arith.constant 0 : i32
    %c0_i32_0 = arith.constant 0 : i32
    %c0_i32_1 = arith.constant 0 : i32
    return %c0_i32, %c0_i32_0 : i32, i32
  }
  func.func @transform_5(%arg0: i32) -> (i32, i32) {
    %c0_i32 = arith.constant 0 : i32
    %c0_i32_0 = arith.constant 0 : i32
    %c0_i32_1 = arith.constant 0 : i32
    return %c0_i32, %c0_i32_0 : i32, i32
  }
  func.func @transform_6(%arg0: i32) -> i32 {
    %c0_i32 = arith.constant 0 : i32
    %c0_i32_0 = arith.constant 0 : i32
    return %c0_i32 : i32
  }
  func.func @transform_7(%arg0: i32) -> (i32, i32) {
    %c0_i32 = arith.constant 0 : i32
    %c0_i32_0 = arith.constant 0 : i32
    return %c0_i32, %arg0 : i32, i32
  }
}

</mosaic_0001>

<bundles_post_ra>
// kernel: tpu_custom_call.1
= control target key start
LH: loop header
LB: loop body
LE: loop exit
PB: predicated region body
PF: predicated region fallthrough
CT: control target
= control target key end

     0   :  { %s1173_s0 = inlined_call_operand.vmem [shape: bf16[5,256], index: 0, kind: input, shape index: {}]   ;;  %s1174_s1 = inlined_call_operand.vmem [shape: bf16[64,5], index: 1, kind: input, shape index: {}]   ;;  %s1175_s2 = inlined_call_operand.vmem [shape: f32[64,1], index: 2, kind: input, shape index: {}]   ;;  %s1176_s3 = inlined_call_operand.vmem [shape: bf16[64,64], index: 3, kind: input, shape index: {}]   ;;  %s1177_s4 = inlined_call_operand.vmem [shape: f32[64,1], index: 4, kind: input, shape index: {}]   ;;  %s1178_s5 = inlined_call_operand.vmem [shape: f32[64,1], index: 5, kind: input, shape index: {}]   ;;  %s1179_s6 = inlined_call_operand.<no memory space> [shape: f32[1], index: 6, kind: input, shape index: {}]   ;;  %s1180_s7 = inlined_call_operand.hbm [shape: f32[1,256], index: 7, kind: output, shape index: {}]  }
   0x1   :  { %12 = sst [smem:[#allocation2]] %s1179_s6 }
   0x2   :  { %13 = vsyncpa [#allocation4], 0 }
   0x3   :  { %15 = vsyncpa [#allocation4 + $0x1], 0  ;;  %s982_s26 = smov 0   ;;  %s984_s27 = smov 0  }
   0x4   :  { %s986_s28 = smov 0   ;;  %s988_s29 = smov 0  }
   0x5 LB: > { %s1003_s6 = sadd.s32 4294967295, %s934_s29   ;;  %s752_s30 = sadd.s32 4294967294, %s934_s29   ;;  %s934_s29 = sphi %s988_s29, %s1186_s29   ;;  %s930_s28 = sphi %s986_s28, %s1185_s28   ;;  %s926_s27 = sphi %s984_s27, %s1184_s27   ;;  %s922_s26 = sphi %s982_s26, %s1183_s26  }
   0x6   : > { %s1007_s8 = sadd.s32 1, %s934_s29   ;;  %s180_s9 = sadd.s32 1, %s930_s28 }
   0x7   : > { %s177_s10 = ssub.s32 %s934_s29, %s1007_s8  ;;  %p190_p0 = scmp.ne.s32.totalorder %s930_s28, %s926_s27 }
   0x8   : > { %p178_p1 = scmp.eq.s32.totalorder %s177_s10, 0  ;;  %p191_p2 = scmp.eq.s32.totalorder %s1003_s6, 1 }
   0x9   : > { %p196_p3 = scmp.ne.s32.totalorder %s926_s27, %s922_s26  ;;  %p197_p4 = scmp.eq.s32.totalorder %s752_s30, 1 }
   0xa   : > { %s1018_s11 = scalar_select %p178_p1, %s930_s28, %s180_s9  }
   0xb   : > { %p1020_p5 = por %p191_p2, %p190_p0  ;;  %p1024_p6 = por %p197_p4, %p196_p3 }
   0xc   : > { %p755_p7 = scmp.ge.s32.totalorder %s934_s29, 1  ;;  %p240_p8 = scmp.lt.s32.totalorder %s934_s29, 3 }
   0xe   : > { %p241_p9 = pnand %p755_p7, %p240_p8 }
   0xf   : > { %p270_p10 = scmp.lt.s32.totalorder (!%p241_p9), %s1003_s6, 1  ;;  %s680_s23 = sld [smem:[#allocation2]] (!%p241_p9) }
  0x10   : > { %244 = sbr.rel (%p241_p9) target bundleno = 505 (0x1f9), region = 48  ;;  %s268_s24 = sand.u32 (!%p241_p9), 1, %s926_s27  }
  0x11   : > { %s773_s25 = sshll.u32 (!%p241_p9), %s1003_s6, 4  ;;  %s269_s30 = scalar_lea.vmem (!%p241_p9), [#allocation3], %s268_s24 }
  0x12   : > { %s697_s9 = sshll.u32 (!%p241_p9), %s269_s30, 4  ;;  %s695_s15 = scalar_lea.hbm (!%p241_p9), %s1180_s7, %s773_s25  ;;  %s698_s9 = int_to_ptr.vmem [resolvable:$true] %s697_s9 }
  0x13   : > { %s938_s18 = smov (!%p241_p9), [#allocation3]  }
  0x14   : > { %s878_s19 = sshll.u32 (!%p241_p9), %s938_s18, 4  ;;  %s879_s19 = int_to_ptr.vmem [resolvable:$false] %s878_s19 }
  0x15   : > { %vm365_vm0 = vcmask 1041408   ;;  %vm366_vm1 = vcmask 1042432   ;;  %v936_v0 = vmov 65535   ;;  %v866_v2 = vld [vmem:[%s1174_s1] sm:$0xff]   ;;  %vm352_vm2 = vcmask 39936   ;;  %s271_s16 = scalar_select %p270_p10, %s1003_s6, 1 }
  0x16   : > { %v367_v1 = vsel %vm365_vm0, 4294967295, %v936_v0  ;;  %791 = vmatprep.mubr.msk.bf16.mxu0 %vm352_vm2, %v866_v2  ;;  %v937_v4 = vmov 0   ;;  %v290_v5 = vld [vmem:[%s1175_s2 + $0x30] sm:$0xff]  ;;  %v288_v6 = vld [vmem:[%s1175_s2 + $0x20] sm:$0xff]  ;;  %v291_v9 = vld [vmem:[%s1175_s2 + $0x38] sm:$0xff]  ;;  %vm525_vm3 = vcmask 523264   ;;  %p881_p0 = scmp.lt.s32.totalorder %s698_s9, %s879_s19 }
  0x17   : > { %s756_s17 = sshll.u32 %s271_s16, 2  ;;  %v368_v3 = vsel %vm366_vm1, %v367_v1, 0  ;;  %864 = vset.pattern.permute.xlu0 %v937_v4  ;;  %865 = vset.pattern.permute.xlu1 %v937_v4  ;;  %v289_v10 = vld [vmem:[%s1175_s2 + $0x28] sm:$0xff]  ;;  %v868_v12 = vld [vmem:[%s1174_s1 + $0x10] sm:$0xff]   ;;  %v287_v14 = vld [vmem:[%s1175_s2 + $0x18] sm:$0xff]  ;;  %s685_s16 = scalar_lea.sflag [#allocation4], %s268_s24 }
  0x18   : > { %s273_s20 = scalar_lea.vmem %s1173_s0, %s756_s17  ;;  %324 = vperm.xlu0 %864, %v290_v5   ;;  %314 = vperm.xlu1 %865, %v288_v6   ;;  %v867_v11 = vld [vmem:[%s1174_s1 + $0x8] sm:$0xff]   ;;  %v286_v13 = vld [vmem:[%s1175_s2 + $0x10] sm:$0xff]  ;;  %v284_v15 = vld [vmem:[%s1175_s2] sm:$0xff]  ;;  %s874_s17 = scalar_lea.vmem %s698_s9, 16 }
  0x19   : > { %v275_v7 = vld [vmem:[%s273_s20] sm:$0x7]  ;;  %v285_v16 = vld [vmem:[%s1175_s2 + $0x8] sm:$0xff]  ;;  %v869_v17 = vld [vmem:[%s1174_s1 + $0x18] sm:$0xff]   ;;  %p875_p11 = scmp.ne.s32.totalorder %s698_s9, %s874_s17  ;;  %s880_s6 = scalar_lea.vmem %s879_s19, 32 }
  0x1a   : > { %v370_v8 = vand.u32 %v368_v3, %v275_v7  ;;  %v457_v18 = vld [vmem:[%s1177_s4] sm:$0xff]  ;;  %v458_v19 = vld [vmem:[%s1177_s4 + $0x8] sm:$0xff]  ;;  %v459_v20 = vld [vmem:[%s1177_s4 + $0x10] sm:$0xff]  ;;  %p882_p1 = scmp.lt.s32.totalorder %s880_s6, %s874_s17 }
  0x1b   : > { %v460_v21 = vld [vmem:[%s1177_s4 + $0x18] sm:$0xff]  ;;  %v611_v22 = vld [vmem:[%s1178_s5] sm:$0xff]  ;;  %v612_v23 = vld [vmem:[%s1178_s5 + $0x8] sm:$0xff]  ;;  %p876_p12 = pnand %p875_p11, %p1020_p5 }
  0x1c   : > { %789 = vmatprep.subr.bf16.mxu0 %v370_v8  ;;  %329 = vperm.xlu0 %864, %v291_v9   ;;  %v461_v24 = vld [vmem:[%s1177_s4 + $0x20] sm:$0xff]  ;;  %v613_v25 = vld [vmem:[%s1178_s5 + $0x10] sm:$0xff]  ;;  %v462_v26 = vld [vmem:[%s1177_s4 + $0x28] sm:$0xff]  ;;  %p883_p2 = por %p882_p1, %p881_p0 }
  0x1d   : > { %790 = vmatpush3.bf16.msra.mxu0 %v370_v8  ;;  %319 = vperm.xlu1 %865, %v289_v10   ;;  %v614_v27 = vld [vmem:[%s1178_s5 + $0x18] sm:$0xff]  ;;  %v463_v28 = vld [vmem:[%s1177_s4 + $0x30] sm:$0xff]  ;;  %v615_v29 = vld [vmem:[%s1178_s5 + $0x20] sm:$0xff]  ;;  %p877_p13 = pneg %p876_p12 }
  0x1e   : > { %v464_v30 = vld [vmem:[%s1177_s4 + $0x38] sm:$0xff]  ;;  %v616_v31 = vld [vmem:[%s1178_s5 + $0x28] sm:$0xff]  ;;  %v617_v32 = vld [vmem:[%s1178_s5 + $0x30] sm:$0xff] }
  0x1f   : > { %v618_v33 = vld [vmem:[%s1178_s5 + $0x38] sm:$0xff]  ;;  %v870_v34 = vld [vmem:[%s1176_s3] sm:$0xff]   ;;  %v871_v35 = vld [vmem:[%s1176_s3 + $0x10] sm:$0xff]   ;;  %p884_p3 = pnand %p883_p2, %p877_p13 }
  0x20   : > { %792 = vmatmul.mubr.msk.bf16.vlgmr.msra.gmra.mxu0 %vm352_vm2, %v867_v11  ;;  %304 = vperm.xlu0 %864, %v286_v13   ;;  %v872_v8 = vld [vmem:[%s1176_s3 + $0x8] sm:$0xff]   ;;  %v873_v9 = vld [vmem:[%s1176_s3 + $0x18] sm:$0xff]  }
  0x21   : > { %795 = vmatprep.mubr.msk.bf16.mxu0 %vm352_vm2, %v868_v12  ;;  %309 = vperm.xlu1 %865, %v287_v14  }
  0x22   : > { %811 = vmatprep.mubr.msk.bf16.mxu1 %vm525_vm3, %v871_v35 }
  0x24   : > { %294 = vperm.xlu0 %864, %v284_v15  }
  0x25   : > { %299 = vperm.xlu1 %865, %v285_v16  }
  0x28   : > { %796 = vmatmul.mubr.msk.bf16.gmra.mxu0 %vm352_vm2, %v869_v17  ;;  %467 = vperm.xlu0 %864, %v457_v18  }
  0x29   : > { %472 = vperm.xlu1 %865, %v458_v19   ;;  %807 = vmatprep.mubr.msk.bf16.mxu0 %vm525_vm3, %v870_v34 }
  0x2c   : > { %477 = vperm.xlu0 %864, %v459_v20  }
  0x2d   : > { %482 = vperm.xlu1 %865, %v460_v21  }
  0x30   : > { %621 = vperm.xlu0 %864, %v611_v22  }
  0x31   : > { %626 = vperm.xlu1 %865, %v612_v23  }
  0x34   : > { %487 = vperm.xlu0 %864, %v461_v24  }
  0x35   : > { %631 = vperm.xlu1 %865, %v613_v25  }
  0x38   : > { %492 = vperm.xlu0 %864, %v462_v26  }
  0x39   : > { %636 = vperm.xlu1 %865, %v614_v27  }
  0x3c   : > { %497 = vperm.xlu0 %864, %v463_v28  }
  0x3d   : > { %641 = vperm.xlu1 %865, %v615_v29  }
  0x40   : > { %502 = vperm.xlu0 %864, %v464_v30  }
  0x41   : > { %646 = vperm.xlu1 %865, %v616_v31  }
  0x44   : > { %651 = vperm.xlu0 %864, %v617_v32  }
  0x45   : > { %656 = vperm.xlu1 %865, %v618_v33  }
  0x93   : > { %v315_v36 = vpop.permute.xlu1 %314  ;;  %v325_v38 = vpop.permute.xlu0 %324 }
  0x97   : > { %v330_v43 = vpop.permute.xlu0 %329 }
  0x98   : > { %v320_v41 = vpop.permute.xlu1 %319 }
  0x9b   : > { %v305_v51 = vpop.permute.xlu0 %304 }
  0x9c   : > { %v310_v47 = vpop.permute.xlu1 %309 }
  0x9f   : > { %v295_v1 = vpop.permute.xlu0 %294 }
  0xa0   : > { %v300_v61 = vpop.permute.xlu1 %299 }
  0xa3   : > { %v468_v10 = vpop.permute.xlu0 %467 }
  0xa4   : > { %v473_v11 = vpop.permute.xlu1 %472 }
  0xa7   : > { %v478_v12 = vpop.permute.xlu0 %477 }
  0xa8   : > { %v483_v13 = vpop.permute.xlu1 %482 }
  0xab   : > { %v622_v14 = vpop.permute.xlu0 %621 }
  0xac   : > { %v627_v15 = vpop.permute.xlu1 %626 }
  0xaf   : > { %v488_v16 = vpop.permute.xlu0 %487 }
  0xb0   : > { %v632_v17 = vpop.permute.xlu1 %631 }
  0xb3   : > { %v493_v20 = vpop.permute.xlu0 %492 }
  0xb4   : > { %v637_v23 = vpop.permute.xlu1 %636 }
  0xb7   : > { %v498_v32 = vpop.permute.xlu0 %497 }
  0xe0   : > { %v793_v37 = vpop.f32.mrf.mxu0 }
  0xe1   : > { %v415_v57 = vadd.f32 %v793_v37, %v305_v51  ;;  %v642_v37 = vpop.permute.xlu1 %641 }
  0xe2   : > { %v406_v39 = vpop.f32.mrf.mxu0 }
  0xe3   : > { %v439_v2 = vmax.f32 %v415_v57, 0.0  ;;  %v407_v3 = vadd.f32 %v406_v39, %v295_v1 }
  0xe4   : > { %v794_v40 = vpop.f32.mrf.mxu0 }
  0xe5   : > { %v418_v53 = vadd.f32 %v794_v40, %v310_v47  ;;  %v437_v6 = vmax.f32 %v407_v3, 0.0  ;;  %v647_v51 = vpop.permute.xlu1 %646 }
  0xe6   : > { %v409_v42 = vpop.f32.mrf.mxu0 }
  0xe7   : > { %v440_v62 = vmax.f32 %v418_v53, 0.0  ;;  %v410_v63 = vadd.f32 %v409_v42, %v300_v61 }
  0xe8   : > { %v797_v44 = vpop.f32.mrf.mxu0 }
  0xe9   : > { %v431_v46 = vadd.f32 %v797_v44, %v325_v38  ;;  %v454_v4 = vpack.c.bf16 %v440_v62, %v439_v2  ;;  %v438_v5 = vmax.f32 %v410_v63, 0.0  ;;  %v657_v61 = vpop.permute.xlu1 %656 }
  0xea   : > { %v422_v45 = vpop.f32.mrf.mxu0 }
  0xeb   : > { %v423_v49 = vadd.f32 %v422_v45, %v315_v36  ;;  %v443_v54 = vmax.f32 %v431_v46, 0.0  ;;  %v453_v7 = vpack.c.bf16 %v438_v5, %v437_v6  ;;  %v503_v46 = vpop.permute.xlu0 %502  ;;  %v681_v6 = vstv %s680_s23 }
  0xec   : > { %v798_v48 = vpop.f32.mrf.mxu0 }
  0xed   : > { %v434_v50 = vadd.f32 %v798_v48, %v330_v43  ;;  %v441_v58 = vmax.f32 %v423_v49, 0.0 }
  0xee   : > { %v425_v52 = vpop.f32.mrf.mxu0 }
  0xef   : > { %v444_v55 = vmax.f32 %v434_v50, 0.0  ;;  %v426_v56 = vadd.f32 %v425_v52, %v320_v41 }
  0xf1   : > { %v456_v59 = vpack.c.bf16 %v444_v55, %v443_v54  ;;  %v442_v60 = vmax.f32 %v426_v56, 0.0 }
  0xf3   : > { %v455_v0 = vpack.c.bf16 %v442_v60, %v441_v58  ;;  %799 = vmatprep.subr.bf16.mxu0 %v456_v59  ;;  %815 = vmatprep.subr.bf16.mxu1 %v456_v59  ;;  %v652_v58 = vpop.permute.xlu0 %651 }
  0xf4   : > { %800 = vmatpush3.bf16.msra.mxu0 %v456_v59  ;;  %819 = vmatpush3.bf16.msra.mxu1 %v456_v59 }
  0xf5   : > { %801 = vmatprep.subr.bf16.mxu0 %v455_v0  ;;  %816 = vmatprep.subr.bf16.mxu1 %v455_v0 }
  0xf8   : > { %802 = vmatpush3.bf16.msra.mxu0 %v455_v0  ;;  %820 = vmatpush3.bf16.msra.mxu1 %v455_v0 }
  0xf9   : > { %803 = vmatprep.subr.bf16.mxu0 %v454_v4  ;;  %817 = vmatprep.subr.bf16.mxu1 %v454_v4 }
  0xfc   : > { %804 = vmatpush3.bf16.msra.mxu0 %v454_v4  ;;  %821 = vmatpush3.bf16.msra.mxu1 %v454_v4 }
  0xfd   : > { %805 = vmatprep.subr.bf16.mxu0 %v453_v7  ;;  %818 = vmatprep.subr.bf16.mxu1 %v453_v7 }
 0x100   : > { %806 = vmatpush3.bf16.msra.mxu0 %v453_v7  ;;  %822 = vmatpush3.bf16.msra.mxu1 %v453_v7 }
 0x103   : > { %808 = vmatmul.mubr.msk.bf16.vlgmr.msra.gmra.mxu0 %vm525_vm3, %v872_v8  ;;  %812 = vmatmul.mubr.msk.bf16.vlgmr.msra.gmra.mxu1 %vm525_vm3, %v873_v9 }
 0x1c3   : > { %v809_v18 = vpop.f32.mrf.mxu0  ;;  %v813_v19 = vpop.f32.mrf.mxu1 }
 0x1c4   : > { %v581_v27 = vadd.f32 %v809_v18, %v478_v12  ;;  %v597_v43 = vadd.f32 %v813_v19, %v498_v32 }
 0x1c5   : > { %v572_v21 = vpop.f32.mrf.mxu0  ;;  %v588_v22 = vpop.f32.mrf.mxu1 }
 0x1c6   : > { %v573_v24 = vadd.f32 %v572_v21, %v468_v10  ;;  %v605_v34 = vmax.f32 %v581_v27, 0.0  ;;  %v589_v35 = vadd.f32 %v588_v22, %v488_v16  ;;  %v609_v52 = vmax.f32 %v597_v43, 0.0 }
 0x1c7   : > { %v810_v25 = vpop.f32.mrf.mxu0  ;;  %v814_v26 = vpop.f32.mrf.mxu1 }
 0x1c8   : > { %v603_v29 = vmax.f32 %v573_v24, 0.0  ;;  %v584_v30 = vadd.f32 %v810_v25, %v483_v13  ;;  %v661_v42 = vmul.f32 %v632_v17, %v605_v34  ;;  %v607_v44 = vmax.f32 %v589_v35, 0.0 }
 0x1c9   : > { %v575_v28 = vpop.f32.mrf.mxu0  ;;  %v591_v33 = vpop.f32.mrf.mxu1  ;;  %v600_v48 = vadd.f32 %v814_v26, %v503_v46  ;;  %v665_v59 = vmul.f32 %v652_v58, %v609_v52 }
 0x1ca   : > { %v576_v31 = vadd.f32 %v575_v28, %v473_v11  ;;  %v659_v38 = vmul.f32 %v622_v14, %v603_v29  ;;  %v606_v39 = vmax.f32 %v584_v30, 0.0  ;;  %v592_v41 = vadd.f32 %v591_v33, %v493_v20 }
 0x1cb   : > { %v663_v53 = vmul.f32 %v642_v37, %v607_v44  ;;  %v610_v55 = vmax.f32 %v600_v48, 0.0 }
 0x1cc   : > { %v604_v36 = vmax.f32 %v576_v31, 0.0  ;;  %v662_v47 = vmul.f32 %v637_v23, %v606_v39  ;;  %v608_v50 = vmax.f32 %v592_v41, 0.0 }
 0x1cd   : > { %v666_v62 = vmul.f32 %v657_v61, %v610_v55 }
 0x1ce   : > { %v660_v40 = vmul.f32 %v627_v15, %v604_v36  ;;  %v664_v56 = vmul.f32 %v647_v51, %v608_v50 }
 0x1d0   : > { %v667_v45 = vadd.f32 %v660_v40, %v659_v38 }
 0x1d2   : > { %v668_v49 = vadd.f32 %v667_v45, %v661_v42 }
 0x1d4   : > { %v669_v54 = vadd.f32 %v668_v49, %v662_v47 }
 0x1d6   : > { %v670_v57 = vadd.f32 %v669_v54, %v663_v53 }
 0x1d8   : > { %v671_v60 = vadd.f32 %v670_v57, %v664_v56 }
 0x1da   : > { %v672_v63 = vadd.f32 %v671_v60, %v665_v59 }
 0x1dc   : > { %v673_v0 = vadd.f32 %v672_v63, %v666_v62 }
 0x1de   : > { %v674_v1 = vrot.slane %v673_v0, 4 }
 0x1e0   : > { %v675_v2 = vadd.f32 %v674_v1, %v673_v0 }
 0x1e2   : > { %v676_v3 = vrot.slane %v675_v2, 2 }
 0x1e4   : > { %v677_v4 = vadd.f32 %v676_v3, %v675_v2 }
 0x1e6   : > { %v678_v5 = vrot.slane %v677_v4, 1 }
 0x1e8   : > { %v679_v7 = vadd.f32 %v678_v5, %v677_v4 }
 0x1ea   : > { %v682_v8 = vadd.f32 %v681_v6, %v679_v7 }
 0x1ec   : > { %683 = vst [vmem:[%s269_s30] sm:$0x1] %v682_v8 }
 0x1ed   : > { %887 = shalt.err (!%p884_p3)
}
 0x1ee   : > { %s888_s20 = scalar_lea.hbm %s695_s15, 16  ;;  %s892_s23 = scalar_lea.hbm %s1180_s7, 32 }
 0x1ef   : > { %p889_p4 = scmp.ne.s32.totalorder %s695_s15, %s888_s20  ;;  %p893_p9 = scmp.lt.s32.totalorder %s695_s15, %s1180_s7 }
 0x1f0   : > { %p894_p10 = scmp.lt.s32.totalorder %s892_s23, %s888_s20 }
 0x1f1   : > { %p890_p7 = pnand %p889_p4, %p1020_p5 }
 0x1f2   : > { %p895_p11 = por %p894_p10, %p893_p9 }
 0x1f3   : > { %p891_p8 = pneg %p890_p7 }
 0x1f5   : > { %p896_p12 = pnand %p895_p11, %p891_p8 }
 0x1f7   : > { %899 = shalt.err (!%p896_p12)
}
 0x1f8   : > { %823 = dma.vmem_to_hbm [thread:$0]  (%p1020_p5), %s698_s9, 16, %s695_s15, %s685_s16  }
 0x1f9 PF: > { %p829_p13 = scmp.ge.s32.totalorder %s934_s29, 2  ;;  %s709_s30 = sand.u32 1, %s922_s26  }
 0x1fa   : > { %s710_s10 = scalar_lea.sflag [#allocation4], %s709_s30 }
 0x1fb   : > { %p826_p0 = pnand %p829_p13, %p1024_p6 }
 0x1fd   : > { %p827_p1 = pneg %p826_p0 }
 0x1ff   : > { %917 = dma.done.wait (%p827_p1), %s710_s10, 16  }
 0x200   : > { %919 = vsyncadd (%p827_p1), %s710_s10, 4294967280  ;;  %p18_p2 = scmp.ge.s32.totalorder %s1007_s8, 4   ;;  %s1183_s26 = smov %s926_s27 }
 0x201   : > { %s1184_s27 = smov %s930_s28  ;;  %s1185_s28 = smov %s1018_s11 }
 0x202   : > { %s1186_s29 = smov %s1007_s8  ;;  %20 = sbr.rel (!%p18_p2) target bundleno = 5 (0x5), region = 83 }
 0x207   :  { %714 = vsyncpa [#allocation4], 1 }
 0x208   :  { %716 = vsyncpa [#allocation4 + $0x1], 1 }

</bundles_post_ra>
